<compile_context>
chip_gen: v7x
topology: tpu7x:2x2x1
jax: 0.10.0
libtpu: 0.0.40
codegen_flags: <defaults>
</compile_context>

<pallas_src>
import functools

import jax
import jax.numpy as jnp
from jax.experimental import pallas as pl
from jax.experimental.pallas import tpu as pltpu


def _round_up(x, m):
    return (x + m - 1) // m * m


def _pick_token_tile(n, max_tile=512):
    """Token tile: large (HBM-roofline friendly), multiple of 16 (bf16 pack)."""
    return min(max_tile, _round_up(n, 16))


def vit_embed_pool_kernel(patches_ref, proj_w_ref, proj_b_ref, pos_ref,
                          ln_w_ref, ln_b_ref, out_ref, *,
                          token_tile, n_tokens, mask_tail):
    t = pl.program_id(1)
    tn = token_tile

    # Patch-embedding conv (kernel == stride) as one bf16 MXU matmul, f32 acc.
    x = patches_ref[0]                                        # (tn, P_pad) bf16
    emb = jnp.dot(x, proj_w_ref[...],
                  preferred_element_type=jnp.float32)         # (tn, D) f32

    # pos_embed is VMEM-resident (bf16, one DMA total); slice this tile's rows.
    start = pl.multiple_of(t * tn, tn)
    pos = pos_ref[pl.ds(start, tn), :].astype(jnp.float32)
    emb = emb + proj_b_ref[...] + pos                         # bias + pos (drop p=0)

    # Final LayerNorm (eps = 1e-6): two-pass f32 statistics (no cancellation).
    mu = jnp.mean(emb, axis=-1, keepdims=True)
    xc = emb - mu
    var = jnp.mean(xc * xc, axis=-1, keepdims=True)
    y = xc * jax.lax.rsqrt(var + 1e-6)
    y = y * ln_w_ref[...] + ln_b_ref[...]

    if mask_tail:
        # Zero out padded tokens so they do not pollute the pooled mean.
        tok = t * tn + jax.lax.broadcasted_iota(jnp.int32, (tn, 1), 0)
        y = jnp.where(tok < n_tokens, y, 0.0)

    # Per-tile partial pooled sums kept as 8 sublane-group rows: sublane-aligned
    # static slices + VALU adds only (no XLU tree reduce / masked 1-row store).
    # The 8->1 reduce, /N and the head GEMM happen outside the kernel in XLA.
    acc8 = y[0:8, :]
    for g in range(1, tn // 8):
        acc8 = acc8 + y[g * 8:(g + 1) * 8, :]
    out_ref[0, 0] = acc8


def prepare_params(params, num_patches, max_token_tile=512):
    """One-time weight prep (pad + bf16 cast), hoisted out of the hot path."""
    P, D = params["proj_w"].shape
    P_pad = _round_up(P, 128)
    tn = _pick_token_tile(num_patches, max_token_tile)
    n_pad = _round_up(num_patches, tn)
    proj_w = jnp.pad(params["proj_w"],
                     ((0, P_pad - P), (0, 0))).astype(jnp.bfloat16)
    pos = jnp.pad(params["pos_embed"],
                  ((0, n_pad - num_patches), (0, 0))).astype(jnp.bfloat16)
    return {
        "proj_w": proj_w,                 # (P_pad, D) bf16, VMEM-resident
        "proj_b": params["proj_b"],       # (1, D) f32
        "pos_embed": pos,                 # (N_pad, D) bf16, VMEM-resident
        "ln_w": params["ln_w"],           # (1, D) f32
        "ln_b": params["ln_b"],           # (1, D) f32
        "head_w": params["head_w"],       # (D, NC) f32, used by XLA head GEMM
        "head_b": params["head_b"],       # (1, NC) f32
    }


@functools.partial(jax.jit, static_argnames=("patch_size",))
def vision_transformer_forward(x, prep, patch_size):
    """x: NCHW float32, prep: prepare_params(...) output. Returns (B, NC) logits."""
    B, C, H, W = x.shape
    ps = patch_size
    Hp, Wp = H // ps, W // ps
    N = Hp * Wp
    P = C * ps * ps
    P_pad, D = prep["proj_w"].shape
    n_pad = prep["pos_embed"].shape[0]
    tn = _pick_token_tile(N)
    num_tiles = n_pad // tn
    assert P_pad == _round_up(P, 128)
    assert n_pad == _round_up(N, tn)

    # Patchify (Conv2d kernel==stride + flatten(2).transpose(1,2)) as ONE fused
    # bf16 copy: cast first so the materialized transpose writes bf16 (half the
    # f32 traffic), pad token + feature axes in the same chain.
    # TODO(synk): move this rearrange into the kernel to eliminate the copy.
    patches = x.astype(jnp.bfloat16)
    patches = patches.reshape(B, C, Hp, ps, Wp, ps)
    patches = patches.transpose(0, 2, 4, 1, 3, 5).reshape(B, N, P)
    patches = jnp.pad(patches, ((0, 0), (0, n_pad - N), (0, P_pad - P)))

    # Per-step VMEM footprint with headroom (double-buffered streamed input,
    # resident weights, f32 working set).
    est = (2 * tn * P_pad * 2 + 2 * P_pad * D * 2 + 2 * n_pad * D * 2
           + 2 * 3 * D * 4 + 2 * 8 * D * 4 + 4 * tn * D * 4)
    vmem_limit = int(min(64 * 1024 * 1024, max(2 * est, 16 * 1024 * 1024)))

    flops = 2 * B * n_pad * P_pad * D + 10 * B * n_pad * D
    bytes_accessed = (B * n_pad * P_pad * 2 + P_pad * D * 2 + n_pad * D * 2
                      + 3 * D * 4 + B * num_tiles * 8 * D * 4)

    grid_spec = pltpu.PrefetchScalarGridSpec(
        num_scalar_prefetch=0,
        grid=(B, num_tiles),
        in_specs=[
            pl.BlockSpec((1, tn, P_pad), lambda b, t: (b, t, 0)),  # patches (streamed)
            pl.BlockSpec((P_pad, D), lambda b, t: (0, 0)),         # proj_w (resident)
            pl.BlockSpec((1, D), lambda b, t: (0, 0)),             # proj_b
            pl.BlockSpec((n_pad, D), lambda b, t: (0, 0)),         # pos_embed (resident, bf16)
            pl.BlockSpec((1, D), lambda b, t: (0, 0)),             # ln_w
            pl.BlockSpec((1, D), lambda b, t: (0, 0)),             # ln_b
        ],
        out_specs=pl.BlockSpec((1, 1, 8, D), lambda b, t: (b, t, 0, 0)),
    )

    parts = pl.pallas_call(
        functools.partial(vit_embed_pool_kernel,
                          token_tile=tn, n_tokens=N, mask_tail=(n_pad != N)),
        out_shape=jax.ShapeDtypeStruct((B, num_tiles, 8, D), jnp.float32),
        grid_spec=grid_spec,
        compiler_params=pltpu.CompilerParams(
            # No cross-step accumulation -> both axes fully parallel (keeps both
            # v7x TensorCores busy even for batch=1 / small batches).
            dimension_semantics=("parallel", "parallel"),
            vmem_limit_bytes=vmem_limit),
        cost_estimate=pl.CostEstimate(flops=int(flops),
                                      transcendentals=int(B * n_pad),
                                      bytes_accessed=int(bytes_accessed)),
    )(patches, prep["proj_w"], prep["proj_b"], prep["pos_embed"],
      prep["ln_w"], prep["ln_b"])

    # Token-mean pooling finish + classifier head as a batched XLA GEMM.
    pooled = parts.sum(axis=(1, 2)) * (1.0 / N)               # (B, D) f32
    return pooled @ prep["head_w"] + prep["head_b"]           # (B, NC)


def init_params(key, in_c, patch_size, embed_dim, num_patches, num_classes):
    """Deterministic synthetic init mimicking _init_vit_weights shapes/scales."""
    k_proj, k_pos, k_head = jax.random.split(key, 3)
    P = in_c * patch_size * patch_size
    # Conv2d kaiming_normal(mode='fan_out'): std = sqrt(2 / (out_ch * kh * kw))
    conv_std = (2.0 / (embed_dim * patch_size * patch_size)) ** 0.5
    return {
        "proj_w": (jax.random.normal(k_proj, (P, embed_dim), jnp.float32)
                   * conv_std),
        "proj_b": jnp.zeros((1, embed_dim), jnp.float32),
        "pos_embed": (jax.random.normal(k_pos, (num_patches, embed_dim),
                                        jnp.float32) * 0.02),
        "ln_w": jnp.ones((1, embed_dim), jnp.float32),
        "ln_b": jnp.zeros((1, embed_dim), jnp.float32),
        "head_w": (jax.random.normal(k_head, (embed_dim, num_classes),
                                     jnp.float32) * 0.01),
        "head_b": jnp.zeros((1, num_classes), jnp.float32),
    }


def reference_forward(x, params, patch_size):
    """Pure-JAX f32 reference of the same forward pass (correctness check)."""
    B, C, H, W = x.shape
    ps = patch_size
    Hp, Wp = H // ps, W // ps
    N = Hp * Wp
    patches = x.reshape(B, C, Hp, ps, Wp, ps)
    patches = patches.transpose(0, 2, 4, 1, 3, 5).reshape(B, N, -1)
    emb = patches @ params["proj_w"] + params["proj_b"] + params["pos_embed"][None]
    mu = emb.mean(-1, keepdims=True)
    var = ((emb - mu) ** 2).mean(-1, keepdims=True)
    y = (emb - mu) / jnp.sqrt(var + 1e-6) * params["ln_w"] + params["ln_b"]
    pooled = y.mean(axis=1)
    return pooled @ params["head_w"] + params["head_b"]


if __name__ == "__main__":
    # Small, module-consistent shapes: img 16x16, patch 4 -> 16 tokens.
    B, C, H, W = 2, 3, 16, 16
    patch_size = 4
    embed_dim = 128          # lane-dense embedding dim
    num_classes = 10
    num_patches = (H // patch_size) * (W // patch_size)

    key = jax.random.PRNGKey(0)
    k_x, k_p = jax.random.split(key)
    x = jax.random.normal(k_x, (B, C, H, W), jnp.float32)
    params = init_params(k_p, C, patch_size, embed_dim, num_patches, num_classes)
    prep = prepare_params(params, num_patches)   # one-time, out of the hot path

    logits = vision_transformer_forward(x, prep, patch_size=patch_size)
    jax.block_until_ready(logits)

    ref = reference_forward(x, params, patch_size)
    assert logits.shape == (B, num_classes)
    assert jnp.allclose(logits, ref, atol=2e-2, rtol=2e-2), "mismatch vs JAX reference"

    print("KERNEL_OK")
</pallas_src>

<mosaic_0001>
module attributes {stable_mosaic.version = 11 : i64} {
  func.func @vit_embed_pool_kernel(%arg0: i32, %arg1: i32, %arg2: memref<1x16x128xbf16, #tpu.memory_space<vmem>>, %arg3: memref<128x128xbf16, #tpu.memory_space<vmem>>, %arg4: memref<1x128xf32, #tpu.memory_space<vmem>>, %arg5: memref<16x128xbf16, #tpu.memory_space<vmem>>, %arg6: memref<1x128xf32, #tpu.memory_space<vmem>>, %arg7: memref<1x128xf32, #tpu.memory_space<vmem>>, %arg8: memref<1x1x8x128xf32, #tpu.memory_space<vmem>>) attributes {dimension_semantics = [#tpu.dimension_semantics<parallel>, #tpu.dimension_semantics<parallel>], iteration_bounds = array<i64: 2, 1>, scalar_prefetch = 0 : i64, scratch_operands = 0 : i64, tpu.core_type = #tpu.core_type<tc>, window_params = [{transform_indices = @transform_0, window_bounds = array<i64: 1, 16, 128>}, {pipeline_mode = #tpu.pipeline_mode<synchronous>, transform_indices = @transform_1, window_bounds = array<i64: 128, 128>}, {pipeline_mode = #tpu.pipeline_mode<synchronous>, transform_indices = @transform_2, window_bounds = array<i64: 1, 128>}, {pipeline_mode = #tpu.pipeline_mode<synchronous>, transform_indices = @transform_3, window_bounds = array<i64: 16, 128>}, {pipeline_mode = #tpu.pipeline_mode<synchronous>, transform_indices = @transform_4, window_bounds = array<i64: 1, 128>}, {pipeline_mode = #tpu.pipeline_mode<synchronous>, transform_indices = @transform_5, window_bounds = array<i64: 1, 128>}, {transform_indices = @transform_6, window_bounds = array<i64: 1, 1, 8, 128>}]} {
    %c0 = arith.constant 0 : index
    %c0_0 = arith.constant 0 : index
    %c0_1 = arith.constant 0 : index
    %0 = vector.load %arg2[%c0, %c0_0, %c0_1] : memref<1x16x128xbf16, #tpu.memory_space<vmem>>, vector<1x16x128xbf16>
    %1 = vector.shape_cast %0 : vector<1x16x128xbf16> to vector<16x128xbf16>
    %c0_2 = arith.constant 0 : index
    %c0_3 = arith.constant 0 : index
    %2 = vector.load %arg3[%c0_2, %c0_3] : memref<128x128xbf16, #tpu.memory_space<vmem>>, vector<128x128xbf16>
    %cst = arith.constant dense<0.000000e+00> : vector<16x128xf32>
    %3 = tpu.matmul %1, %2, %cst {dimension_numbers = #tpu.dot_dimension_numbers<[1], [0], [0], [1], [0, 0, 1, 1], [], []>} : vector<16x128xbf16>, vector<128x128xbf16>, vector<16x128xf32> -> vector<16x128xf32>
    %c16_i32 = arith.constant 16 : i32
    %4 = arith.muli %arg1, %c16_i32 : i32
    %5 = tpu.assume_multiple %4, 16 : i32
    %6 = arith.index_cast %5 : i32 to index
    %c0_4 = arith.constant 0 : index
    %7 = vector.load %arg5[%6, %c0_4] : memref<16x128xbf16, #tpu.memory_space<vmem>>, vector<16x128xbf16>
    %8 = arith.extf %7 : vector<16x128xbf16> to vector<16x128xf32>
    %c0_5 = arith.constant 0 : index
    %c0_6 = arith.constant 0 : index
    %9 = vector.load %arg4[%c0_5, %c0_6] : memref<1x128xf32, #tpu.memory_space<vmem>>, vector<1x128xf32>
    %10 = vector.broadcast %9 : vector<1x128xf32> to vector<16x128xf32>
    %11 = arith.addf %3, %10 : vector<16x128xf32>
    %12 = arith.addf %11, %8 : vector<16x128xf32>
    %cst_7 = arith.constant dense<0.000000e+00> : vector<16xf32>
    %13 = vector.multi_reduction <add>, %12, %cst_7 [1] : vector<16x128xf32> to vector<16xf32>
    %14 = vector.shape_cast %13 : vector<16xf32> to vector<16x1xf32>
    %cst_8 = arith.constant 1.280000e+02 : f32
    %15 = vector.broadcast %cst_8 : f32 to vector<16x1xf32>
    %16 = arith.divf %14, %15 : vector<16x1xf32>
    %17 = vector.broadcast %16 : vector<16x1xf32> to vector<16x128xf32>
    %18 = arith.subf %12, %17 : vector<16x128xf32>
    %19 = arith.mulf %18, %18 : vector<16x128xf32>
    %cst_9 = arith.constant dense<0.000000e+00> : vector<16xf32>
    %20 = vector.multi_reduction <add>, %19, %cst_9 [1] : vector<16x128xf32> to vector<16xf32>
    %21 = vector.shape_cast %20 : vector<16xf32> to vector<16x1xf32>
    %cst_10 = arith.constant 1.280000e+02 : f32
    %22 = vector.broadcast %cst_10 : f32 to vector<16x1xf32>
    %23 = arith.divf %21, %22 : vector<16x1xf32>
    %cst_11 = arith.constant 9.99999997E-7 : f32
    %24 = vector.broadcast %cst_11 : f32 to vector<16x1xf32>
    %25 = arith.addf %23, %24 : vector<16x1xf32>
    %26 = math.rsqrt %25 : vector<16x1xf32>
    %27 = vector.broadcast %26 : vector<16x1xf32> to vector<16x128xf32>
    %28 = arith.mulf %18, %27 : vector<16x128xf32>
    %c0_12 = arith.constant 0 : index
    %c0_13 = arith.constant 0 : index
    %29 = vector.load %arg6[%c0_12, %c0_13] : memref<1x128xf32, #tpu.memory_space<vmem>>, vector<1x128xf32>
    %30 = vector.broadcast %29 : vector<1x128xf32> to vector<16x128xf32>
    %31 = arith.mulf %28, %30 : vector<16x128xf32>
    %c0_14 = arith.constant 0 : index
    %c0_15 = arith.constant 0 : index
    %32 = vector.load %arg7[%c0_14, %c0_15] : memref<1x128xf32, #tpu.memory_space<vmem>>, vector<1x128xf32>
    %33 = vector.broadcast %32 : vector<1x128xf32> to vector<16x128xf32>
    %34 = arith.addf %31, %33 : vector<16x128xf32>
    %35 = vector.extract_strided_slice %34 {offsets = [0, 0], sizes = [8, 128], strides = [1, 1]} : vector<16x128xf32> to vector<8x128xf32>
    %36 = vector.extract_strided_slice %34 {offsets = [8, 0], sizes = [8, 128], strides = [1, 1]} : vector<16x128xf32> to vector<8x128xf32>
    %37 = arith.addf %35, %36 : vector<8x128xf32>
    %c0_16 = arith.constant 0 : index
    %c0_17 = arith.constant 0 : index
    %c0_18 = arith.constant 0 : index
    %c0_19 = arith.constant 0 : index
    %38 = vector.load %arg8[%c0_16, %c0_17, %c0_18, %c0_19] : memref<1x1x8x128xf32, #tpu.memory_space<vmem>>, vector<1x1x8x128xf32>
    %39 = vector.shape_cast %38 : vector<1x1x8x128xf32> to vector<8x128xf32>
    %40 = vector.shape_cast %37 : vector<8x128xf32> to vector<1x1x8x128xf32>
    tpu.vector_store %arg8[%c0_16, %c0_17, %c0_18, %c0_19], %40 {strides = array<i32>} : memref<1x1x8x128xf32, #tpu.memory_space<vmem>>, vector<1x1x8x128xf32>,
    return
  }
  func.func @transform_0(%arg0: i32, %arg1: i32) -> (i32, i32, i32) {
    %c0_i32 = arith.constant 0 : i32
    %c0_i32_0 = arith.constant 0 : i32
    return %arg0, %arg1, %c0_i32 : i32, i32, i32
  }
  func.func @transform_1(%arg0: i32, %arg1: i32) -> (i32, i32) {
    %c0_i32 = arith.constant 0 : i32
    %c0_i32_0 = arith.constant 0 : i32
    %c0_i32_1 = arith.constant 0 : i32
    return %c0_i32, %c0_i32_0 : i32, i32
  }
  func.func @transform_2(%arg0: i32, %arg1: i32) -> (i32, i32) {
    %c0_i32 = arith.constant 0 : i32
    %c0_i32_0 = arith.constant 0 : i32
    %c0_i32_1 = arith.constant 0 : i32
    return %c0_i32, %c0_i32_0 : i32, i32
  }
  func.func @transform_3(%arg0: i32, %arg1: i32) -> (i32, i32) {
    %c0_i32 = arith.constant 0 : i32
    %c0_i32_0 = arith.constant 0 : i32
    %c0_i32_1 = arith.constant 0 : i32
    return %c0_i32, %c0_i32_0 : i32, i32
  }
  func.func @transform_4(%arg0: i32, %arg1: i32) -> (i32, i32) {
    %c0_i32 = arith.constant 0 : i32
    %c0_i32_0 = arith.constant 0 : i32
    %c0_i32_1 = arith.constant 0 : i32
    return %c0_i32, %c0_i32_0 : i32, i32
  }
  func.func @transform_5(%arg0: i32, %arg1: i32) -> (i32, i32) {
    %c0_i32 = arith.constant 0 : i32
    %c0_i32_0 = arith.constant 0 : i32
    %c0_i32_1 = arith.constant 0 : i32
    return %c0_i32, %c0_i32_0 : i32, i32
  }
  func.func @transform_6(%arg0: i32, %arg1: i32) -> (i32, i32, i32, i32) {
    %c0_i32 = arith.constant 0 : i32
    %c0_i32_0 = arith.constant 0 : i32
    %c0_i32_1 = arith.constant 0 : i32
    return %arg0, %arg1, %c0_i32, %c0_i32_0 : i32, i32, i32, i32
  }
}

</mosaic_0001>

<bundles_post_ra>
// kernel: vision_transformer_forward.1
= control target key start
LH: loop header
LB: loop body
LE: loop exit
PB: predicated region body
PF: predicated region fallthrough
CT: control target
= control target key end

     0   :  { %s696_s21 = smov 0   ;;  %s698_s22 = smov 0   ;;  %s772_s0 = inlined_call_operand.vmem [shape: bf16[2,16,128], index: 0, kind: input, shape index: {}]   ;;  %s773_s1 = inlined_call_operand.vmem [shape: bf16[128,128], index: 1, kind: input, shape index: {}]   ;;  %s774_s2 = inlined_call_operand.vmem [shape: f32[1,128], index: 2, kind: input, shape index: {}]   ;;  %s775_s3 = inlined_call_operand.vmem [shape: bf16[16,128], index: 3, kind: input, shape index: {}]   ;;  %s776_s4 = inlined_call_operand.vmem [shape: f32[1,128], index: 4, kind: input, shape index: {}]   ;;  %s777_s5 = inlined_call_operand.vmem [shape: f32[1,128], index: 5, kind: input, shape index: {}]   ;;  %s778_s6 = inlined_call_operand.vmem [shape: f32[2,1,8,128], index: 6, kind: output, shape index: {}]  }
   0x1   :  { %s700_s23 = smov 0  }
   0x2 LB: > { %s28_s24 = sadd.s32 1, %s653_s22  ;;  %p544_p0 = scmp.ge.s32.totalorder %s657_s23, 1  ;;  %s657_s23 = sphi %s700_s23, %s16_s23   ;;  %s653_s22 = sphi %s698_s22, %s780_s22   ;;  %s649_s21 = sphi %s696_s21, %s779_s21  }
   0x3   : > { %p30_p1 = scmp.ge.s32.totalorder %s28_s24, 2  ;;  %p233_p2 = scmp.lt.s32.totalorder %s657_s23, 3 }
   0x5   : > { %s782_s24 = smov (%p30_p1, %s28_s24), 0  ;;  %p234_p3 = pnand %p544_p0, %p233_p2 }
   0x6   : > { %v622_v0 = vld [vmem:[%s773_s1] sm:$0xff] (!%p234_p3)   ;;  %v659_v1 = vmov (!%p234_p3), 0.0   ;;  %v623_v2 = vld [vmem:[%s773_s1 + $0x8] sm:$0xff] (!%p234_p3)   ;;  %vm660_vm0 = vmmov (!%p234_p3), 0   ;;  %p270_p4 = scmp.lt.s32.totalorder (!%p234_p3), %s649_s21, 1  ;;  %v624_v3 = vld [vmem:[%s773_s1 + $0x10] sm:$0xff] (!%p234_p3)  }
   0x7   : > { %237 = sbr.rel (%p234_p3) target bundleno = 573 (0x23d), region = 44  ;;  %576 = vmatprep.subr.bf16.mxu0 (!%p234_p3), %v659_v1  ;;  %592 = vmatprep.mubr.msk.bf16.mxu0 (!%p234_p3), %vm660_vm0, %v659_v1  ;;  %v625_v4 = vld [vmem:[%s773_s1 + $0x18] sm:$0xff] (!%p234_p3)   ;;  %v626_v5 = vld [vmem:[%s773_s1 + $0x20] sm:$0xff] (!%p234_p3)   ;;  %v627_v6 = vld [vmem:[%s773_s1 + $0x28] sm:$0xff] (!%p234_p3)  }
   0x8   : > { %577 = vmatpush3.bf16.msra.mxu0 (!%p234_p3), %v622_v0  ;;  %v628_v7 = vld [vmem:[%s773_s1 + $0x30] sm:$0xff] (!%p234_p3)   ;;  %v629_v8 = vld [vmem:[%s773_s1 + $0x38] sm:$0xff] (!%p234_p3)   ;;  %v564_v10 = vld [vmem:[%s775_s3] sm:$0xff] (!%p234_p3)  }
   0x9   : > { %578 = vmatprep.subr.bf16.mxu0 (!%p234_p3), %v659_v1  ;;  %v548_v11 = vld [vmem:[%s774_s2] ss:$0 sm:$0xff] (!%p234_p3)  ;;  %v565_v12 = vunpack.c.l.bf16 (!%p234_p3), %v564_v10  ;;  %v566_v20 = vunpack.c.h.bf16 (!%p234_p3), %v564_v10 }
   0xa   : > { %v558_v38 = vld [vmem:[%s776_s4] ss:$0 sm:$0xff] (!%p234_p3) }
   0xb   : > { %v559_v42 = vld [vmem:[%s777_s5] ss:$0 sm:$0xff] (!%p234_p3) }
   0xc   : > { %579 = vmatpush3.bf16.msra.mxu0 (!%p234_p3), %v623_v2 }
   0xd   : > { %580 = vmatprep.subr.bf16.mxu0 (!%p234_p3), %v659_v1 }
   0xe   : > { %s784_s21 = smov (!%p270_p4, %s649_s21), 1 }
   0xf   : > { %s562_s7 = sshll.u32 %s784_s21, 3 }
  0x10   : > { %s277_s10 = scalar_lea.vmem %s772_s0, %s562_s7  ;;  %581 = vmatpush3.bf16.msra.mxu0 %v624_v3  ;;  %s285_s12 = scalar_lea.vmem %s778_s6, %s562_s7 }
  0x11   : > { %582 = vmatprep.subr.bf16.mxu0 %v659_v1  ;;  %v630_v9 = vld [vmem:[%s277_s10] sm:$0xff]  }
  0x14   : > { %583 = vmatpush3.bf16.msra.mxu0 %v625_v4 }
  0x15   : > { %584 = vmatprep.subr.bf16.mxu0 %v659_v1 }
  0x18   : > { %585 = vmatpush3.bf16.msra.mxu0 %v626_v5 }
  0x19   : > { %586 = vmatprep.subr.bf16.mxu0 %v659_v1 }
  0x1c   : > { %587 = vmatpush3.bf16.msra.mxu0 %v627_v6 }
  0x1d   : > { %588 = vmatprep.subr.bf16.mxu0 %v659_v1 }
  0x20   : > { %589 = vmatpush3.bf16.msra.mxu0 %v628_v7 }
  0x21   : > { %590 = vmatprep.subr.bf16.mxu0 %v659_v1 }
  0x24   : > { %591 = vmatpush3.bf16.msra.mxu0 %v629_v8 }
  0x27   : > { %593 = vmatmul.mubr.bf16.vlgmr.msra.gmra.mrb[0].mxu0 %v630_v9 }
  0xfa   : > { %v409_v13 = vpop.f32.mrb[0].mxu0 }
  0xfb   : > { %v410_v14 = vadd.f32 %v548_v11, %v409_v13  ;;  %v594_v15 = vpop.f32.mrb[1].mxu0 }
  0xfc   : > { %v412_v16 = vpop.f32.mrb[2].mxu0 }
  0xfd   : > { %v413_v17 = vadd.f32 %v548_v11, %v412_v16  ;;  %v595_v18 = vpop.f32.mrb[3].mxu0  ;;  %v416_v19 = vadd.f32 %v565_v12, %v410_v14 }
  0xff   : > { %418 = vadd.xlane.f32.xlu0 %v416_v19  ;;  %v417_v21 = vadd.f32 %v566_v20, %v413_v17 }
 0x103   : > { %420 = vadd.xlane.f32.xlu0 %v417_v21 }
 0x18c   : > { %v419_v22 = vpop.xlane.xlu0 %418 }
 0x18d   : > { %v423_v23 = vmul.f32 0.0078125, %v419_v22 }
 0x18f   : > { %v425_v24 = vsub.f32 %v416_v19, %v423_v23 }
 0x190   : > { %v421_v25 = vpop.xlane.xlu0 %420 }
 0x191   : > { %v424_v26 = vmul.f32 0.0078125, %v421_v25  ;;  %v427_v27 = vmul.f32 %v425_v24, %v425_v24 }
 0x193   : > { %v426_v28 = vsub.f32 %v417_v21, %v424_v26  ;;  %429 = vadd.xlane.f32.xlu1 %v427_v27 }
 0x195   : > { %v428_v29 = vmul.f32 %v426_v28, %v426_v28 }
 0x197   : > { %431 = vadd.xlane.f32.xlu1 %v428_v29 }
 0x220   : > { %v430_v30 = vpop.xlane.xlu1 %429 }
 0x221   : > { %v433_v31 = vmul.f32 0.0078125, %v430_v30 }
 0x223   : > { %v435_v32 = vadd.f32 1e-06, %v433_v31 }
 0x224   : > { %v432_v33 = vpop.xlane.xlu1 %431 }
 0x225   : > { %631 = vrsqrt.f32 %v435_v32  ;;  %v434_v34 = vmul.f32 0.0078125, %v432_v33 }
 0x227   : > { %v436_v35 = vadd.f32 1e-06, %v434_v34 }
 0x229   : > { %633 = vrsqrt.f32 %v436_v35 }
 0x22f   : > { %v632_v36 = vpop.eup %631 }
 0x230   : > { %v439_v37 = vmul.f32 %v632_v36, %v425_v24 }
 0x232   : > { %v448_v40 = vmul.f32 %v558_v38, %v439_v37 }
 0x233   : > { %v634_v39 = vpop.eup %633 }
 0x234   : > { %v440_v41 = vmul.f32 %v634_v39, %v426_v28  ;;  %v457_v44 = vadd.f32 %v559_v42, %v448_v40 }
 0x236   : > { %v449_v43 = vmul.f32 %v558_v38, %v440_v41 }
 0x238   : > { %v458_v45 = vadd.f32 %v559_v42, %v449_v43 }
 0x23a   : > { %v459_v46 = vadd.f32 %v458_v45, %v457_v44 }
 0x23c   : > { %460 = vst [vmem:[%s285_s12] sm:$0xff] %v459_v46 }
 0x23d PF: > { %s16_s23 = sadd.s32 1, %s657_s23   ;;  %s779_s21 = smov %s653_s22 }
 0x23e   : > { %p13_p5 = scmp.ge.s32.totalorder %s16_s23, 4   ;;  %s780_s22 = smov %s782_s24 }
 0x240   :  { %15 = sbr.rel (!%p13_p5) target bundleno = 2 (0x2), region = 75 }

</bundles_post_ra>
